<compile_context>
chip_gen: v5e
topology: v5e:2x2
jax: 0.10.0
libtpu: 0.0.40
codegen_flags: <defaults>
</compile_context>

<pallas_src>
import jax
import jax.numpy as jnp
from jax.experimental import pallas as pl
from jax.experimental.pallas import tpu as pltpu


_VMEM_LIMIT = 32 * 1024 * 1024  # safe on v5e/v6e (128 MiB phys) and v7x (64 MiB phys)

# Fixed (deterministic) Sobel coefficients, exactly as in EdgeExtractor.__init__.
_SOBEL_X = ((-1.0, 0.0, 1.0),
            (-2.0, 0.0, 2.0),
            (-1.0, 0.0, 1.0))
_SOBEL_Y = ((-1.0, -2.0, -1.0),
            ( 0.0,  0.0,  0.0),
            ( 1.0,  2.0,  1.0))


def _sobel_edge(x):
    """|sobel_x(x)| + |sobel_y(x)| for x: (B, H, W) f32 with zero padding=1.

    Separable factorization:
      sobel_x = [1, 2, 1]^T (rows) x [-1, 0, 1] (cols)
      sobel_y = [-1, 0, 1]^T (rows) x [ 1, 2, 1] (cols)
    Zero-filled shifts reproduce the Conv2d zero padding exactly.
    """
    B, H, W = x.shape
    zrow = jnp.zeros((B, 1, W), x.dtype)
    zcol = jnp.zeros((B, H, 1), x.dtype)

    # Vertical (sublane) shifts with zero fill == zero padding in H.
    up = jnp.concatenate([x[:, 1:, :], zrow], axis=1)    # x[y+1]
    dn = jnp.concatenate([zrow, x[:, :-1, :]], axis=1)   # x[y-1]
    s = dn + 2.0 * x + up                                # vertical [1, 2, 1]
    d = up - dn                                          # vertical [-1, 0, 1]

    # Horizontal (lane) shifts with zero fill == zero padding in W.
    s_l = jnp.concatenate([s[:, :, 1:], zcol], axis=2)   # s[x+1]
    s_r = jnp.concatenate([zcol, s[:, :, :-1]], axis=2)  # s[x-1]
    d_l = jnp.concatenate([d[:, :, 1:], zcol], axis=2)   # d[x+1]
    d_r = jnp.concatenate([zcol, d[:, :, :-1]], axis=2)  # d[x-1]

    ex = s_l - s_r                                       # horizontal [-1, 0, 1]
    ey = d_r + 2.0 * d + d_l                             # horizontal [ 1, 2, 1]
    return jnp.abs(ex) + jnp.abs(ey)


def _sobel_minmax_kernel(x_ref, mm_ref):
    """Pass 1: running global min/max of the Sobel edge magnitude.

    x_ref:  (tile_nc, H, W) image tile (VMEM, pipelined over the channel grid)
    mm_ref: (2,) f32 SMEM accumulator ([0]=min, [1]=max), resident across grid.
    """
    i = pl.program_id(0)
    edge = _sobel_edge(x_ref[...].astype(jnp.float32))
    bmin = jnp.min(edge)
    bmax = jnp.max(edge)

    @pl.when(i == 0)
    def _():
        mm_ref[0] = bmin
        mm_ref[1] = bmax

    @pl.when(i != 0)
    def _():
        mm_ref[0] = jnp.minimum(mm_ref[0], bmin)
        mm_ref[1] = jnp.maximum(mm_ref[1], bmax)


def _sobel_apply_kernel(mm_ref, x_ref, o_ref):
    """Pass 2: recompute the edge tile and write img * normalize(edge).

    Recomputing the cheap VPU Sobel avoids an extra HBM round-trip of the
    full edge map. Normalization uses one scalar reciprocal per tile and a
    broadcast multiply (no per-element divide).
    """
    x = x_ref[...].astype(jnp.float32)
    edge = _sobel_edge(x)
    emin = mm_ref[0]
    # Matches PyTorch semantics: no epsilon guard (constant input -> inf/nan).
    inv = 1.0 / (mm_ref[1] - emin)
    o_ref[...] = (x * ((edge - emin) * inv)).astype(o_ref.dtype)


def edge_extractor(img, *, tile_nc=None, tile_bytes=1 << 20):
    """img: (N, C, H, W). Returns img * globally-normalized Sobel edge map."""
    N, C, H, W = img.shape
    NC = N * C
    x = img.reshape(NC, H, W)  # free reshape: NCHW is contiguous, channels independent

    if tile_nc is None:
        budget = max(1, tile_bytes // (H * W * 4))
        tile_nc = 1
        for t in range(min(NC, budget), 0, -1):
            if NC % t == 0:
                tile_nc = t
                break
    if NC % tile_nc != 0:
        raise ValueError(f"tile_nc={tile_nc} must divide N*C={NC}")
    grid = (NC // tile_nc,)

    img_blk = pl.BlockSpec((tile_nc, H, W), lambda i: (i, 0, 0))
    smem_full = pl.BlockSpec(memory_space=pltpu.MemorySpace.SMEM)

    # TODO(synk): for images whose single-channel (H, W) plane exceeds the VMEM
    # tile budget, add an H-tiling level with a 1-row halo (manual DMA or
    # Element-offset index_map); the current grid tiles over channels only.

    # Pass 1: global min/max of the Sobel magnitude (sequential running reduce).
    minmax = pl.pallas_call(
        _sobel_minmax_kernel,
        out_shape=jax.ShapeDtypeStruct((2,), jnp.float32),
        grid=grid,
        in_specs=[img_blk],
        out_specs=smem_full,
        compiler_params=pltpu.CompilerParams(
            dimension_semantics=("arbitrary",),   # running min/max across tiles
            vmem_limit_bytes=_VMEM_LIMIT),
    )(x)

    # Pass 2: recompute edge per tile, normalize, multiply. Tiles independent.
    out = pl.pallas_call(
        _sobel_apply_kernel,
        out_shape=jax.ShapeDtypeStruct((NC, H, W), img.dtype),
        grid=grid,
        in_specs=[smem_full, img_blk],
        out_specs=img_blk,
        compiler_params=pltpu.CompilerParams(
            dimension_semantics=("parallel",),    # v7x megacore sharding
            vmem_limit_bytes=_VMEM_LIMIT),
    )(minmax, x)

    return out.reshape(N, C, H, W)


def _edge_extractor_ref(img):
    """Pure-JAX reference (same depthwise-Sobel semantics) for verification."""
    img = img.astype(jnp.float32)
    kx = jnp.array(_SOBEL_X, jnp.float32)
    ky = jnp.array(_SOBEL_Y, jnp.float32)
    N, C, H, W = img.shape
    x = img.reshape(N * C, 1, H, W)
    wx = kx.reshape(1, 1, 3, 3)
    wy = ky.reshape(1, 1, 3, 3)
    dn = jax.lax.conv_dimension_numbers(x.shape, wx.shape, ("NCHW", "OIHW", "NCHW"))
    ex = jax.lax.conv_general_dilated(x, wx, (1, 1), ((1, 1), (1, 1)), dimension_numbers=dn)
    ey = jax.lax.conv_general_dilated(x, wy, (1, 1), ((1, 1), (1, 1)), dimension_numbers=dn)
    edge = jnp.abs(ex) + jnp.abs(ey)
    edge = (edge - edge.min()) / (edge.max() - edge.min())
    return img * edge.reshape(N, C, H, W)


if __name__ == "__main__":
    key = jax.random.PRNGKey(0)
    # EdgeExtractor operates on 3-channel images.
    img = jax.random.uniform(key, (2, 3, 16, 16), dtype=jnp.float32)

    out = edge_extractor(img)
    jax.block_until_ready(out)
    ref = _edge_extractor_ref(img)
    assert out.shape == img.shape and out.dtype == img.dtype
    assert jnp.allclose(out, ref, rtol=1e-5, atol=1e-5)

    # Multi-block grid (exercises the SMEM running min/max and pipelining).
    out_b = edge_extractor(img, tile_nc=2)
    jax.block_until_ready(out_b)
    assert jnp.allclose(out_b, ref, rtol=1e-5, atol=1e-5)

    # Lane-dense (W = 128) multi-block case.
    img2 = jax.random.uniform(jax.random.PRNGKey(0), (1, 3, 24, 128), dtype=jnp.float32)
    out2 = edge_extractor(img2, tile_nc=1)
    jax.block_until_ready(out2)
    ref2 = _edge_extractor_ref(img2)
    assert jnp.allclose(out2, ref2, rtol=1e-5, atol=1e-5)

    print("KERNEL_OK")
</pallas_src>

<mosaic_0001>
module attributes {stable_mosaic.version = 11 : i64} {
  func.func @_sobel_minmax_kernel(%arg0: i32, %arg1: memref<6x16x16xf32, #tpu.memory_space<vmem>>, %arg2: memref<2xf32, #tpu.memory_space<smem>>) attributes {dimension_semantics = [#tpu.dimension_semantics<arbitrary>], iteration_bounds = array<i64: 1>, scalar_prefetch = 0 : i64, scratch_operands = 0 : i64, tpu.core_type = #tpu.core_type<tc>, window_params = [{transform_indices = @transform_0, window_bounds = array<i64: 6, 16, 16>}, {transform_indices = @transform_1, window_bounds = array<i64: 2>}]} {
    %c0 = arith.constant 0 : index
    %c0_0 = arith.constant 0 : index
    %c0_1 = arith.constant 0 : index
    %0 = vector.load %arg1[%c0, %c0_0, %c0_1] : memref<6x16x16xf32, #tpu.memory_space<vmem>>, vector<6x16x16xf32>
    %cst = arith.constant 0.000000e+00 : f32
    %1 = vector.broadcast %cst : f32 to vector<6x1x16xf32>
    %cst_2 = arith.constant 0.000000e+00 : f32
    %2 = vector.broadcast %cst_2 : f32 to vector<6x16x1xf32>
    %3 = vector.extract_strided_slice %0 {offsets = [0, 1, 0], sizes = [6, 15, 16], strides = [1, 1, 1]} : vector<6x16x16xf32> to vector<6x15x16xf32>
    %4 = tpu.concatenate %3, %1 in 1 : vector<6x15x16xf32>, vector<6x1x16xf32> -> vector<6x16x16xf32>
    %5 = vector.extract_strided_slice %0 {offsets = [0, 0, 0], sizes = [6, 15, 16], strides = [1, 1, 1]} : vector<6x16x16xf32> to vector<6x15x16xf32>
    %6 = tpu.concatenate %1, %5 in 1 : vector<6x1x16xf32>, vector<6x15x16xf32> -> vector<6x16x16xf32>
    %cst_3 = arith.constant 2.000000e+00 : f32
    %7 = vector.broadcast %cst_3 : f32 to vector<6x16x16xf32>
    %8 = arith.mulf %7, %0 : vector<6x16x16xf32>
    %9 = arith.addf %6, %8 : vector<6x16x16xf32>
    %10 = arith.addf %9, %4 : vector<6x16x16xf32>
    %11 = arith.subf %4, %6 : vector<6x16x16xf32>
    %12 = vector.extract_strided_slice %10 {offsets = [0, 0, 1], sizes = [6, 16, 15], strides = [1, 1, 1]} : vector<6x16x16xf32> to vector<6x16x15xf32>
    %13 = tpu.concatenate %12, %2 in 2 : vector<6x16x15xf32>, vector<6x16x1xf32> -> vector<6x16x16xf32>
    %14 = vector.extract_strided_slice %10 {offsets = [0, 0, 0], sizes = [6, 16, 15], strides = [1, 1, 1]} : vector<6x16x16xf32> to vector<6x16x15xf32>
    %15 = tpu.concatenate %2, %14 in 2 : vector<6x16x1xf32>, vector<6x16x15xf32> -> vector<6x16x16xf32>
    %16 = vector.extract_strided_slice %11 {offsets = [0, 0, 1], sizes = [6, 16, 15], strides = [1, 1, 1]} : vector<6x16x16xf32> to vector<6x16x15xf32>
    %17 = tpu.concatenate %16, %2 in 2 : vector<6x16x15xf32>, vector<6x16x1xf32> -> vector<6x16x16xf32>
    %18 = vector.extract_strided_slice %11 {offsets = [0, 0, 0], sizes = [6, 16, 15], strides = [1, 1, 1]} : vector<6x16x16xf32> to vector<6x16x15xf32>
    %19 = tpu.concatenate %2, %18 in 2 : vector<6x16x1xf32>, vector<6x16x15xf32> -> vector<6x16x16xf32>
    %20 = arith.subf %13, %15 : vector<6x16x16xf32>
    %cst_4 = arith.constant 2.000000e+00 : f32
    %21 = vector.broadcast %cst_4 : f32 to vector<6x16x16xf32>
    %22 = arith.mulf %21, %11 : vector<6x16x16xf32>
    %23 = arith.addf %19, %22 : vector<6x16x16xf32>
    %24 = arith.addf %23, %17 : vector<6x16x16xf32>
    %25 = math.absf %20 : vector<6x16x16xf32>
    %26 = math.absf %24 : vector<6x16x16xf32>
    %27 = arith.addf %25, %26 : vector<6x16x16xf32>
    %28 = vector.shape_cast %27 : vector<6x16x16xf32> to vector<1x6x16x16xf32>
    %cst_5 = arith.constant dense<0x7F800000> : vector<1xf32>
    %29 = vector.multi_reduction <minimumf>, %28, %cst_5 [1, 2, 3] : vector<1x6x16x16xf32> to vector<1xf32>
    %30 = vector.shape_cast %29 : vector<1xf32> to vector<1x1x1x1xf32>
    %31 = vector.extract %30[0, 0, 0, 0] : f32 from vector<1x1x1x1xf32>
    %32 = vector.shape_cast %27 : vector<6x16x16xf32> to vector<1x6x16x16xf32>
    %cst_6 = arith.constant dense<0xFF800000> : vector<1xf32>
    %33 = vector.multi_reduction <maximumf>, %32, %cst_6 [1, 2, 3] : vector<1x6x16x16xf32> to vector<1xf32>
    %34 = vector.shape_cast %33 : vector<1xf32> to vector<1x1x1x1xf32>
    %35 = vector.extract %34[0, 0, 0, 0] : f32 from vector<1x1x1x1xf32>
    %c0_i32 = arith.constant 0 : i32
    %36 = arith.cmpi eq, %arg0, %c0_i32 : i32
    %37 = arith.extui %36 : i1 to i32
    %c0_i32_7 = arith.constant 0 : i32
    %38 = arith.cmpi ne, %37, %c0_i32_7 : i32
    scf.if %38 {
      %c0_10 = arith.constant 0 : index
      %42 = memref.load %arg2[%c0_10] : memref<2xf32, #tpu.memory_space<smem>>
      memref.store %31, %arg2[%c0_10] : memref<2xf32, #tpu.memory_space<smem>>
      %c1 = arith.constant 1 : index
      %43 = memref.load %arg2[%c1] : memref<2xf32, #tpu.memory_space<smem>>
      memref.store %35, %arg2[%c1] : memref<2xf32, #tpu.memory_space<smem>>
    } else {
    }
    %c0_i32_8 = arith.constant 0 : i32
    %39 = arith.cmpi ne, %arg0, %c0_i32_8 : i32
    %40 = arith.extui %39 : i1 to i32
    %c0_i32_9 = arith.constant 0 : i32
    %41 = arith.cmpi ne, %40, %c0_i32_9 : i32
    scf.if %41 {
      %c0_10 = arith.constant 0 : index
      %42 = memref.load %arg2[%c0_10] : memref<2xf32, #tpu.memory_space<smem>>
      %43 = arith.minimumf %42, %31 : f32
      %c0_11 = arith.constant 0 : index
      %44 = memref.load %arg2[%c0_11] : memref<2xf32, #tpu.memory_space<smem>>
      memref.store %43, %arg2[%c0_11] : memref<2xf32, #tpu.memory_space<smem>>
      %c1 = arith.constant 1 : index
      %45 = memref.load %arg2[%c1] : memref<2xf32, #tpu.memory_space<smem>>
      %46 = arith.maximumf %45, %35 : f32
      %c1_12 = arith.constant 1 : index
      %47 = memref.load %arg2[%c1_12] : memref<2xf32, #tpu.memory_space<smem>>
      memref.store %46, %arg2[%c1_12] : memref<2xf32, #tpu.memory_space<smem>>
    } else {
    }
    return
  }
  func.func @transform_0(%arg0: i32) -> (i32, i32, i32) {
    %c0_i32 = arith.constant 0 : i32
    %c0_i32_0 = arith.constant 0 : i32
    %c0_i32_1 = arith.constant 0 : i32
    return %arg0, %c0_i32, %c0_i32_0 : i32, i32, i32
  }
  func.func @transform_1(%arg0: i32) -> i32 {
    %c0_i32 = arith.constant 0 : i32
    %c0_i32_0 = arith.constant 0 : i32
    return %c0_i32 : i32
  }
}

</mosaic_0001>

<bundles_post_ra>
// kernel: tpu_custom_call.1
= control target key start
LH: loop header
LB: loop body
LE: loop exit
PB: predicated region body
PF: predicated region fallthrough
CT: control target
= control target key end

     0   :  { %6 = vsyncpa [#allocation3], 0  ;;  %s987_s0 = inlined_call_operand.hbm [shape: f32[6,16,16], index: 0, kind: input, shape index: {}]   ;;  %s988_s1 = inlined_call_operand.hbm [shape: f32[2], index: 1, kind: output, shape index: {}]  }
   0x1   :  { %7 = vsyncpa [#allocation4], 0  ;;  %s12_s8 = sshll.u32 %s987_s0, 4  ;;  %s625_s9 = smov [#allocation2]   ;;  %s13_s8 = int_to_ptr.hbm [resolvable:$true] %s12_s8 }
   0x2   :  { %s14_s10 = sshll.u32 %s625_s9, 4  ;;  %s626_s11 = smov 128   ;;  %s15_s10 = int_to_ptr.vmem [resolvable:$true] %s14_s10 }
   0x3   :  { %s627_s12 = smov 8  }
   0x4   :  { %20 = dma.hbm_to_vmem [thread:$0]  %s13_s8, 1536, %s15_s10, [#allocation3], %s626_s11, %s626_s11, %s627_s12  }
   0x5   :  { %621 = dma.done.wait [#allocation3], 1536  }
   0x6   :  { %622 = vsyncadd [#allocation3], 4294965760  ;;  %v644_v0 = vld [vmem:[#allocation2 + $0x20] sm:$0xff]  ;;  %v646_v1 = vld [vmem:[#allocation2 + $0x28] sm:$0xff]  ;;  %vm49_vm0 = vcmask 1046528   ;;  %vm86_vm1 = vcmask 1040384  }
   0x7   :  { %v27_v2 = vld [vmem:[#allocation2 + $0x10] sm:$0xff]  ;;  %v56_v3 = vrot.slane %v644_v0, 1  ;;  %v57_v4 = vrot.slane %v646_v1, 1  ;;  %v93_v5 = vrot.slane %v644_v0, 7  ;;  %v28_v6 = vld [vmem:[#allocation2 + $0x18] sm:$0xff]  ;;  %v25_v8 = vld [vmem:[#allocation2] sm:$0xff] }
   0x8   :  { %v53_v7 = vrot.slane %v27_v2, 1  ;;  %v54_v9 = vrot.slane %v28_v6, 1  ;;  %v90_v10 = vrot.slane %v27_v2, 7  ;;  %v26_v11 = vld [vmem:[#allocation2 + $0x8] sm:$0xff]  ;;  %v50_v12 = vrot.slane %v25_v8, 1  ;;  %s628_s0 = smov 1  }
   0x9   :  { %v87_v13 = vrot.slane %v25_v8, 7  ;;  %v652_v14 = vsel %vm49_vm0, %v56_v3, %v57_v4  ;;  %v655_v15 = vsel %vm86_vm1, 0.0, %v93_v5  ;;  %v51_v16 = vrot.slane %v26_v11, 1  ;;  %v31_v33 = vld [vmem:[#allocation2 + $0x30] sm:$0xff]  ;;  %v32_v34 = vld [vmem:[#allocation2 + $0x38] sm:$0xff]  ;;  %s629_s13 = smov 127  }
   0xa   :  { %v659_v17 = vsub.f32 %v652_v14, %v655_v15  ;;  %v55_v18 = vsel %vm49_vm0, %v53_v7, %v54_v9  ;;  %v118_v19 = vsel %vm86_vm1, 0.0, %v90_v10  ;;  %v94_v23 = vrot.slane %v646_v1, 7  ;;  %s563_s16 = sshll.u32 %s988_s1, 4  ;;  %s630_s19 = smov [#allocation5]   ;;  %s564_s16 = int_to_ptr.hbm [resolvable:$true] %s563_s16 }
   0xb   :  { %v117_v20 = vsel %vm86_vm1, 0.0, %v87_v13  ;;  %v664_v21 = vsub.f32 %v55_v18, %v118_v19  ;;  %v52_v22 = vsel %vm49_vm0, %v50_v12, %v51_v16  ;;  %v91_v25 = vrot.slane %v28_v6, 7 }
   0xc   :  { %349 = vrot.lane.b32.xlu2 %v659_v17, %s628_s0  ;;  %v670_v24 = vsub.f32 %v52_v22, %v117_v20  ;;  %v88_v26 = vrot.slane %v26_v11, 7  ;;  %v82_v27 = vsel %vm49_vm0, %v57_v4, 0.0  ;;  %v95_v28 = vsel %vm86_vm1, %v93_v5, %v94_v23 }
   0xd   :  { %345 = vrot.lane.b32.xlu1 %v664_v21, %s628_s0  ;;  %v81_v29 = vsel %vm49_vm0, %v54_v9, 0.0  ;;  %v92_v30 = vsel %vm86_vm1, %v90_v10, %v91_v25  ;;  %v80_v31 = vsel %vm49_vm0, %v51_v16, 0.0  ;;  %v682_v35 = vsub.f32 %v82_v27, %v95_v28  ;;  %v34_v9 = vld [vmem:[#allocation2 + $0x48] sm:$0xff] }
   0xe   :  { %341 = vrot.lane.b32.xlu0 %v670_v24, %s628_s0  ;;  %v89_v32 = vsel %vm86_vm1, %v87_v13, %v88_v26  ;;  %v123_v36 = vmul.f32 2.0, %v25_v8  ;;  %v684_v37 = vsub.f32 %v81_v29, %v92_v30  ;;  %v60_v39 = vrot.slane %v32_v34, 1  ;;  %v33_v8 = vld [vmem:[#allocation2 + $0x40] sm:$0xff] }
   0xf   :  { %v686_v38 = vsub.f32 %v80_v31, %v89_v32  ;;  %v96_v40 = vrot.slane %v31_v33, 7  ;;  %v97_v41 = vrot.slane %v32_v34, 7  ;;  %v59_v42 = vrot.slane %v31_v33, 1 }
  0x10   :  { %v135_v43 = vadd.f32 %v123_v36, %v117_v20  ;;  %v83_v44 = vsel %vm49_vm0, %v60_v39, 0.0  ;;  %v126_v49 = vmul.f32 2.0, %v28_v6  ;;  %v125_v51 = vmul.f32 2.0, %v27_v2  ;;  %v35_v20 = vld [vmem:[#allocation2 + $0x50] sm:$0xff] }
  0x11   :  { %v98_v45 = vsel %vm86_vm1, %v96_v40, %v97_v41  ;;  %v61_v46 = vsel %vm49_vm0, %v59_v42, %v60_v39  ;;  %v120_v47 = vsel %vm86_vm1, 0.0, %v96_v40  ;;  %v124_v53 = vmul.f32 2.0, %v26_v11 }
  0x12   :  { %v147_v48 = vadd.f32 %v135_v43, %v52_v22  ;;  %v698_v50 = vsub.f32 %v83_v44, %v98_v45  ;;  %v700_v52 = vsub.f32 %v61_v46, %v120_v47  ;;  %v138_v54 = vadd.f32 %v126_v49, %v92_v30  ;;  %v36_v22 = vld [vmem:[#allocation2 + $0x58] sm:$0xff] }
  0x13   :  { %v137_v55 = vadd.f32 %v125_v51, %v118_v19  ;;  %v136_v56 = vadd.f32 %v124_v53, %v89_v32  ;;  %v129_v58 = vmul.f32 2.0, %v31_v33  ;;  %v128_v60 = vmul.f32 2.0, %v646_v1 }
  0x14   :  { %351 = vrot.lane.b32.xlu2 %v682_v35, %s628_s0  ;;  %v150_v57 = vadd.f32 %v138_v54, %v81_v29  ;;  %v127_v62 = vmul.f32 2.0, %v644_v0  ;;  %v130_v7 = vmul.f32 2.0, %v32_v34  ;;  %v62_v10 = vrot.slane %v33_v8, 1 }
  0x15   :  { %347 = vrot.lane.b32.xlu1 %v684_v37, %s628_s0  ;;  %v149_v59 = vadd.f32 %v137_v55, %v55_v18  ;;  %v148_v61 = vadd.f32 %v136_v56, %v80_v31  ;;  %v141_v63 = vadd.f32 %v129_v58, %v120_v47  ;;  %v140_v2 = vadd.f32 %v128_v60, %v95_v28 }
  0x16   :  { %343 = vrot.lane.b32.xlu0 %v686_v38, %s628_s0  ;;  %v139_v3 = vadd.f32 %v127_v62, %v655_v15  ;;  %v142_v0 = vadd.f32 %v130_v7, %v98_v45  ;;  %v63_v11 = vrot.slane %v34_v9, 1  ;;  %v99_v12 = vrot.slane %v33_v8, 7 }
  0x17   :  { %v153_v4 = vadd.f32 %v141_v63, %v61_v46  ;;  %v152_v5 = vadd.f32 %v140_v2, %v82_v27  ;;  %v100_v18 = vrot.slane %v34_v9, 7  ;;  %v65_v25 = vrot.slane %v35_v20, 1 }
  0x18   :  { %v151_v6 = vadd.f32 %v139_v3, %v652_v14  ;;  %v154_v1 = vadd.f32 %v142_v0, %v83_v44  ;;  %v64_v13 = vsel %vm49_vm0, %v62_v10, %v63_v11  ;;  %v121_v14 = vsel %vm86_vm1, 0.0, %v99_v12 }
  0x19   :  { %v723_v15 = vsub.f32 %v64_v13, %v121_v14  ;;  %v84_v16 = vsel %vm49_vm0, %v63_v11, 0.0  ;;  %v101_v19 = vsel %vm86_vm1, %v99_v12, %v100_v18  ;;  %v66_v26 = vrot.slane %v36_v22, 1 }
  0x1a   :  { %v729_v23 = vsub.f32 %v84_v16, %v101_v19  ;;  %v102_v27 = vrot.slane %v35_v20, 7  ;;  %v103_v28 = vrot.slane %v36_v22, 7  ;;  %v131_v36 = vmul.f32 2.0, %v33_v8 }
  0x1b   :  { %v67_v29 = vsel %vm49_vm0, %v65_v25, %v66_v26  ;;  %v85_v31 = vsel %vm49_vm0, %v66_v26, 0.0  ;;  %v132_v39 = vmul.f32 2.0, %v34_v9  ;;  %v133_v40 = vmul.f32 2.0, %v35_v20 }
  0x1c   :  { %183 = vrot.lane.b32.xlu2 %v147_v48, %s629_s13  ;;  %v122_v30 = vsel %vm86_vm1, 0.0, %v102_v27  ;;  %v104_v33 = vsel %vm86_vm1, %v102_v27, %v103_v28  ;;  %v143_v41 = vadd.f32 %v131_v36, %v121_v14  ;;  %v134_v47 = vmul.f32 2.0, %v36_v22 }
  0x1d   :  { %355 = vrot.lane.b32.xlu1 %v698_v50, %s628_s0  ;;  %v735_v32 = vsub.f32 %v67_v29, %v122_v30  ;;  %v739_v34 = vsub.f32 %v85_v31, %v104_v33  ;;  %v144_v42 = vadd.f32 %v132_v39, %v101_v19  ;;  %v145_v43 = vadd.f32 %v133_v40, %v122_v30 }
  0x1e   :  { %353 = vrot.lane.b32.xlu0 %v700_v52, %s628_s0  ;;  %v155_v44 = vadd.f32 %v143_v41, %v64_v13  ;;  %v406_v53 = vmul.f32 2.0, %v682_v35  ;;  %vm268_vm2 = vcmask 7168   ;;  %vm219_vm3 = vcmask 121856  }
  0x1f   :  { %v156_v45 = vadd.f32 %v144_v42, %v84_v16  ;;  %v157_v46 = vadd.f32 %v145_v43, %v67_v29  ;;  %v403_v25 = vmul.f32 2.0, %v664_v21  ;;  %vm473_vm4 = vcmask 130048  }
  0x24   :  { %189 = vrot.lane.b32.xlu2 %v150_v57, %s629_s13 }
  0x25   :  { %187 = vrot.lane.b32.xlu1 %v149_v59, %s629_s13 }
  0x26   :  { %185 = vrot.lane.b32.xlu0 %v148_v61, %s629_s13 }
  0x2c   :  { %195 = vrot.lane.b32.xlu2 %v153_v4, %s629_s13 }
  0x2d   :  { %193 = vrot.lane.b32.xlu1 %v152_v5, %s629_s13 }
  0x2e   :  { %191 = vrot.lane.b32.xlu0 %v151_v6, %s629_s13 }
  0x34   :  { %234 = vrot.lane.b32.xlu2 %v148_v61, %s628_s0 }
  0x35   :  { %232 = vrot.lane.b32.xlu1 %v147_v48, %s628_s0  ;;  %v146_v48 = vadd.f32 %v134_v47, %v104_v33 }
  0x36   :  { %197 = vrot.lane.b32.xlu0 %v154_v1, %s629_s13 }
  0x37   :  { %v158_v49 = vadd.f32 %v146_v48, %v85_v31 }
  0x3c   :  { %240 = vrot.lane.b32.xlu2 %v151_v6, %s628_s0 }
  0x3d   :  { %238 = vrot.lane.b32.xlu1 %v150_v57, %s628_s0 }
  0x3e   :  { %236 = vrot.lane.b32.xlu0 %v149_v59, %s628_s0 }
  0x44   :  { %246 = vrot.lane.b32.xlu2 %v154_v1, %s628_s0 }
  0x45   :  { %244 = vrot.lane.b32.xlu1 %v153_v4, %s628_s0 }
  0x46   :  { %242 = vrot.lane.b32.xlu0 %v152_v5, %s628_s0 }
  0x4c   :  { %297 = vrot.lane.b32.xlu2 %v664_v21, %s629_s13 }
  0x4d   :  { %295 = vrot.lane.b32.xlu1 %v686_v38, %s629_s13 }
  0x4e   :  { %293 = vrot.lane.b32.xlu0 %v670_v24, %s629_s13 }
  0x54   :  { %303 = vrot.lane.b32.xlu2 %v682_v35, %s629_s13 }
  0x55   :  { %301 = vrot.lane.b32.xlu1 %v659_v17, %s629_s13 }
  0x56   :  { %299 = vrot.lane.b32.xlu0 %v684_v37, %s629_s13 }
  0x5c   :  { %357 = vrot.lane.b32.xlu2 %v723_v15, %s628_s0 }
  0x5d   :  { %307 = vrot.lane.b32.xlu1 %v698_v50, %s629_s13 }
  0x5e   :  { %305 = vrot.lane.b32.xlu0 %v700_v52, %s629_s13 }
  0x64   :  { %363 = vrot.lane.b32.xlu2 %v739_v34, %s628_s0 }
  0x65   :  { %361 = vrot.lane.b32.xlu1 %v735_v32, %s628_s0 }
  0x66   :  { %359 = vrot.lane.b32.xlu0 %v729_v23, %s628_s0  ;;  %v766_v51 = vpop.permute.xlu2 %349 }
  0x6c   :  { %203 = vrot.lane.b32.xlu2 %v157_v46, %s629_s13 }
  0x6d   :  { %201 = vrot.lane.b32.xlu1 %v156_v45, %s629_s13 }
  0x6e   :  { %199 = vrot.lane.b32.xlu0 %v155_v44, %s629_s13  ;;  %v352_v54 = vpop.permute.xlu2 %351 }
  0x6f   :  { %v382_v55 = vsel %vm268_vm2, 0.0, %v352_v54 }
  0x70   :  { %v418_v56 = vadd.f32 %v406_v53, %v382_v55 }
  0x74   :  { %250 = vrot.lane.b32.xlu2 %v156_v45, %s628_s0 }
  0x75   :  { %248 = vrot.lane.b32.xlu1 %v155_v44, %s628_s0 }
  0x76   :  { %205 = vrot.lane.b32.xlu0 %v158_v49, %s629_s13  ;;  %v184_v57 = vpop.permute.xlu2 %183 }
  0x77   :  { %v220_v18 = vsel %vm219_vm3, %v184_v57, 0.0 }
  0x7c   :  { %309 = vrot.lane.b32.xlu2 %v723_v15, %s629_s13 }
  0x7d   :  { %254 = vrot.lane.b32.xlu1 %v158_v49, %s628_s0 }
  0x7e   :  { %252 = vrot.lane.b32.xlu0 %v157_v46, %s628_s0  ;;  %v190_v35 = vpop.permute.xlu2 %189 }
  0x7f   :  { %v346_v58 = vpop.permute.xlu1 %345  ;;  %v814_v30 = vsel %vm219_vm3, %v190_v35, 0.0  ;;  %v402_v35 = vmul.f32 2.0, %v686_v38 }
  0x80   :  { %v342_v59 = vpop.permute.xlu0 %341  ;;  %v379_v26 = vsel %vm268_vm2, 0.0, %v346_v58  ;;  %v401_v58 = vmul.f32 2.0, %v670_v24  ;;  %v405_v24 = vmul.f32 2.0, %v659_v17 }
  0x81   :  { %v415_v28 = vadd.f32 %v403_v25, %v379_v26 }
  0x84   :  { %315 = vrot.lane.b32.xlu2 %v739_v34, %s629_s13 }
  0x85   :  { %313 = vrot.lane.b32.xlu1 %v735_v32, %s629_s13 }
  0x86   :  { %311 = vrot.lane.b32.xlu0 %v729_v23, %s629_s13  ;;  %v786_v60 = vpop.permute.xlu2 %195 }
  0x87   :  { %v788_v61 = vpop.permute.xlu1 %347 }
  0x88   :  { %v344_v62 = vpop.permute.xlu0 %343 }
  0x8e   :  { %v235_v63 = vpop.permute.xlu2 %234 }
  0x8f   :  { %v790_v2 = vpop.permute.xlu1 %355  ;;  %v270_v5 = vsel %vm268_vm2, 0.0, %v235_v63  ;;  %v378_v63 = vsel %vm268_vm2, 0.0, %v344_v62  ;;  %v404_v62 = vmul.f32 2.0, %v684_v37 }
  0x90   :  { %v792_v3 = vpop.permute.xlu0 %353 }
  0x96   :  { %v241_v4 = vpop.permute.xlu2 %240 }
  0x97   :  { %v188_v6 = vpop.permute.xlu1 %187  ;;  %v799_v9 = vsel %vm268_vm2, 0.0, %v241_v4 }
  0x98   :  { %v186_v7 = vpop.permute.xlu0 %185  ;;  %v222_v40 = vsel %vm219_vm3, %v188_v6, 0.0  ;;  %v377_v6 = vsel %vm268_vm2, 0.0, %v342_v59 }
  0x99   :  { %v221_v0 = vsel %vm219_vm3, %v186_v7, 0.0 }
  0x9a   :  { %v390_v1 = vsub.f32 %v221_v0, %v270_v5 }
  0x9c   :  { %v438_v38 = vand.u32 2147483647, %v390_v1 }
  0x9e   :  { %v796_v8 = vpop.permute.xlu2 %246 }
  0x9f   :  { %v194_v10 = vpop.permute.xlu1 %193 }
  0xa0   :  { %v192_v11 = vpop.permute.xlu0 %191  ;;  %v225_v53 = vsel %vm219_vm3, %v194_v10, 0.0 }
  0xa1   :  { %v802_v12 = vsel %vm219_vm3, %v192_v11, 0.0  ;;  %v413_v11 = vadd.f32 %v401_v58, %v377_v6 }
  0xa2   :  { %v393_v13 = vsub.f32 %v802_v12, %v799_v9 }
  0xa6   :  { %v298_v14 = vpop.permute.xlu2 %297 }
  0xa7   :  { %v233_v16 = vpop.permute.xlu1 %232  ;;  %v331_v27 = vsel %vm219_vm3, %v298_v14, 0.0 }
  0xa8   :  { %v807_v19 = vpop.permute.xlu0 %197  ;;  %v269_v20 = vsel %vm268_vm2, 0.0, %v233_v16  ;;  %v427_v31 = vadd.f32 %v415_v28, %v331_v27  ;;  %v381_v28 = vsel %vm268_vm2, 0.0, %v766_v51 }
  0xa9   :  { %v389_v22 = vsub.f32 %v220_v18, %v269_v20  ;;  %v417_v51 = vadd.f32 %v405_v24, %v381_v28 }
  0xaa   :  { %v451_v43 = vand.u32 2147483647, %v427_v31 }
  0xab   :  { %v437_v26 = vand.u32 2147483647, %v389_v22 }
  0xae   :  { %v304_v39 = vpop.permute.xlu2 %303 }
  0xaf   :  { %v239_v29 = vpop.permute.xlu1 %238  ;;  %v334_v45 = vsel %vm219_vm3, %v304_v39, 0.0 }
  0xb0   :  { %v237_v33 = vpop.permute.xlu0 %236  ;;  %v817_v36 = vsel %vm268_vm2, 0.0, %v239_v29  ;;  %v430_v48 = vadd.f32 %v418_v56, %v334_v45  ;;  %v414_v56 = vadd.f32 %v402_v35, %v378_v63  ;;  %v380_v29 = vsel %vm268_vm2, 0.0, %v788_v61 }
  0xb1   :  { %v271_v41 = vsel %vm268_vm2, 0.0, %v237_v33  ;;  %v392_v21 = vsub.f32 %v814_v30, %v817_v36  ;;  %v416_v36 = vadd.f32 %v404_v62, %v380_v29  ;;  %v407_v45 = vmul.f32 2.0, %v700_v52 }
  0xb2   :  { %v391_v42 = vsub.f32 %v222_v40, %v271_v41  ;;  %v454_v4 = vand.u32 2147483647, %v430_v48  ;;  %v408_v41 = vmul.f32 2.0, %v698_v50  ;;  %v276_v50 = vsel %vm268_vm2, 0.0, %v796_v8 }
  0xb3   :  { %v227_v35 = vsel %vm219_vm3, %v807_v19, 0.0  ;;  %v226_v63 = vsel %vm219_vm3, %v786_v60, 0.0 }
  0xb4   :  { %v439_v44 = vand.u32 2147483647, %v391_v42 }
  0xb6   :  { %v824_v46 = vadd.f32 %v451_v43, %v439_v44  ;;  %v828_v57 = vpop.permute.xlu2 %357  ;;  %v384_v44 = vsel %vm268_vm2, 0.0, %v790_v2 }
  0xb7   :  { %v245_v47 = vpop.permute.xlu1 %244  ;;  %v420_v9 = vadd.f32 %v408_v41, %v384_v44 }
  0xb8   :  { %v243_v49 = vpop.permute.xlu0 %242  ;;  %v275_v2 = vsel %vm268_vm2, 0.0, %v245_v47 }
  0xb9   :  { %v274_v54 = vsel %vm268_vm2, 0.0, %v243_v49  ;;  %v395_v6 = vsub.f32 %v226_v63, %v275_v2  ;;  %v409_v2 = vmul.f32 2.0, %v723_v15 }
  0xba   :  { %v394_v55 = vsub.f32 %v225_v53, %v274_v54  ;;  %v383_v53 = vsel %vm268_vm2, 0.0, %v792_v3  ;;  %v441_v54 = vand.u32 2147483647, %v393_v13  ;;  %v396_v13 = vsub.f32 %v227_v35, %v276_v50 }
  0xbb   :  { %v419_v12 = vadd.f32 %v407_v45, %v383_v53  ;;  %v412_v50 = vmul.f32 2.0, %v739_v34 }
  0xbc   :  { %v442_v5 = vand.u32 2147483647, %v394_v55  ;;  %v440_v55 = vand.u32 2147483647, %v392_v21 }
  0xbe   :  { %v466_v7 = vadd.f32 %v454_v4, %v442_v5  ;;  %v838_v59 = vpop.permute.xlu2 %363 }
  0xbf   :  { %v296_v0 = vpop.permute.xlu1 %295  ;;  %v388_v35 = vsel %vm268_vm2, 0.0, %v838_v59 }
  0xc0   :  { %v294_v10 = vpop.permute.xlu0 %293  ;;  %v330_v14 = vsel %vm219_vm3, %v296_v0, 0.0  ;;  %v845_v1 = vsel %vm473_vm4, %v466_v7, inf  ;;  %v848_v17 = vsel %vm473_vm4, %v466_v7, -inf }
  0xc1   :  { %v329_v16 = vsel %vm219_vm3, %v294_v10, 0.0  ;;  %v426_v18 = vadd.f32 %v414_v56, %v330_v14 }
  0xc2   :  { %v425_v20 = vadd.f32 %v413_v11, %v329_v16 }
  0xc3   :  { %v450_v25 = vand.u32 2147483647, %v426_v18  ;;  %v444_v18 = vand.u32 2147483647, %v396_v13 }
  0xc4   :  { %v449_v27 = vand.u32 2147483647, %v425_v20  ;;  %v443_v20 = vand.u32 2147483647, %v395_v6 }
  0xc5   :  { %v462_v30 = vadd.f32 %v450_v25, %v438_v38 }
  0xc6   :  { %v461_v31 = vadd.f32 %v449_v27, %v437_v26  ;;  %v878_v5 = vpop.permute.xlu2 %203  ;;  %v900_v26 = vsel %vm473_vm4, %v824_v46, inf  ;;  %v904_v27 = vsel %vm473_vm4, %v824_v46, -inf }
  0xc7   :  { %v851_v37 = vsel %vm473_vm4, %v462_v30, inf  ;;  %v854_v22 = vsel %vm473_vm4, %v462_v30, -inf  ;;  %v302_v33 = vpop.permute.xlu1 %301 }
  0xc8   :  { %v481_v61 = vmin.f32 %v851_v37, %v845_v1  ;;  %v513_v39 = vmax.f32 %v854_v22, %v848_v17  ;;  %v300_v40 = vpop.permute.xlu0 %299  ;;  %v333_v43 = vsel %vm219_vm3, %v302_v33, 0.0  ;;  %v881_v21 = vsel %vm473_vm4, %v461_v31, inf }
  0xc9   :  { %v332_v42 = vsel %vm219_vm3, %v300_v40, 0.0  ;;  %v429_v49 = vadd.f32 %v417_v51, %v333_v43  ;;  %v884_v19 = vsel %vm473_vm4, %v461_v31, -inf }
  0xca   :  { %v428_v48 = vadd.f32 %v416_v36, %v332_v42 }
  0xcb   :  { %v453_v52 = vand.u32 2147483647, %v429_v49 }
  0xcc   :  { %v452_v58 = vand.u32 2147483647, %v428_v48 }
  0xcd   :  { %v465_v3 = vadd.f32 %v453_v52, %v441_v54 }
  0xce   :  { %v464_v4 = vadd.f32 %v452_v58, %v440_v55  ;;  %v251_v46 = vpop.permute.xlu2 %250  ;;  %v385_v58 = vsel %vm268_vm2, 0.0, %v828_v57  ;;  %v410_v57 = vmul.f32 2.0, %v729_v23 }
  0xcf   :  { %v308_v8 = vpop.permute.xlu1 %307  ;;  %v887_v47 = vsel %vm473_vm4, %v465_v3, inf  ;;  %v890_v60 = vsel %vm473_vm4, %v465_v3, -inf  ;;  %v424_v3 = vadd.f32 %v412_v50, %v388_v35  ;;  %v421_v15 = vadd.f32 %v409_v2, %v385_v58 }
  0xd0   :  { %v306_v7 = vpop.permute.xlu0 %305  ;;  %v479_v56 = vmin.f32 %v881_v21, %v887_v47  ;;  %v511_v0 = vmax.f32 %v884_v19, %v890_v60  ;;  %v336_v10 = vsel %vm219_vm3, %v308_v8, 0.0  ;;  %v907_v28 = vsel %vm473_vm4, %v464_v4, inf }
  0xd1   :  { %v335_v11 = vsel %vm219_vm3, %v306_v7, 0.0  ;;  %v432_v16 = vadd.f32 %v420_v9, %v336_v10  ;;  %v910_v29 = vsel %vm473_vm4, %v464_v4, -inf  ;;  %v411_v10 = vmul.f32 2.0, %v735_v32 }
  0xd2   :  { %v431_v14 = vadd.f32 %v419_v12, %v335_v11 }
  0xd3   :  { %v456_v25 = vand.u32 2147483647, %v432_v16 }
  0xd4   :  { %v455_v38 = vand.u32 2147483647, %v431_v14 }
  0xd5   :  { %v468_v62 = vadd.f32 %v456_v25, %v444_v18 }
  0xd6   :  { %v467_v24 = vadd.f32 %v455_v38, %v443_v20  ;;  %v310_v49 = vpop.permute.xlu2 %309  ;;  %v278_v38 = vsel %vm268_vm2, 0.0, %v251_v46 }
  0xd7   :  { %v362_v30 = vpop.permute.xlu1 %361  ;;  %v919_v51 = vsel %vm473_vm4, %v468_v62, inf  ;;  %v922_v36 = vsel %vm473_vm4, %v468_v62, -inf  ;;  %v337_v13 = vsel %vm219_vm3, %v310_v49, 0.0 }
  0xd8   :  { %v913_v31 = vsel %vm473_vm4, %v467_v24, inf  ;;  %v916_v33 = vsel %vm473_vm4, %v467_v24, -inf  ;;  %v360_v40 = vpop.permute.xlu0 %359  ;;  %v485_v43 = vmin.f32 %v907_v28, %v919_v51  ;;  %v517_v44 = vmax.f32 %v910_v29, %v922_v36 }
  0xd9   :  { %v483_v41 = vmin.f32 %v900_v26, %v913_v31  ;;  %v515_v42 = vmax.f32 %v904_v27, %v916_v33  ;;  %v386_v11 = vsel %vm268_vm2, 0.0, %v360_v40  ;;  %v387_v14 = vsel %vm268_vm2, 0.0, %v362_v30 }
  0xda   :  { %v433_v16 = vadd.f32 %v421_v15, %v337_v13  ;;  %v230_v24 = vsel %vm219_vm3, %v878_v5, 0.0  ;;  %v422_v23 = vadd.f32 %v410_v57, %v386_v11  ;;  %v423_v36 = vadd.f32 %v411_v10, %v387_v14 }
  0xdc   :  { %v457_v32 = vand.u32 2147483647, %v433_v16 }
  0xde   :  { %v316_v55 = vpop.permute.xlu2 %315 }
  0xdf   :  { %v202_v45 = vpop.permute.xlu1 %201  ;;  %v340_v52 = vsel %vm219_vm3, %v316_v55, 0.0 }
  0xe0   :  { %v200_v48 = vpop.permute.xlu0 %199  ;;  %v436_v8 = vadd.f32 %v424_v3, %v340_v52  ;;  %v229_v25 = vsel %vm219_vm3, %v202_v45, 0.0 }
  0xe1   :  { %v228_v59 = vsel %vm219_vm3, %v200_v48, 0.0  ;;  %v398_v49 = vsub.f32 %v229_v25, %v278_v38 }
  0xe2   :  { %v460_v62 = vand.u32 2147483647, %v436_v8 }
  0xe3   :  { %v446_v5 = vand.u32 2147483647, %v398_v49 }
  0xe7   :  { %v249_v53 = vpop.permute.xlu1 %248 }
  0xe8   :  { %v206_v54 = vpop.permute.xlu0 %205  ;;  %v277_v63 = vsel %vm268_vm2, 0.0, %v249_v53 }
  0xe9   :  { %v231_v9 = vsel %vm219_vm3, %v206_v54, 0.0  ;;  %v397_v7 = vsub.f32 %v228_v59, %v277_v63 }
  0xeb   :  { %v445_v29 = vand.u32 2147483647, %v397_v7 }
  0xed   :  { %v469_v55 = vadd.f32 %v457_v32, %v445_v29 }
  0xef   :  { %v255_v4 = vpop.permute.xlu1 %254  ;;  %v486_v3 = vsel %vm473_vm4, %v469_v55, inf }
  0xf0   :  { %v253_v12 = vpop.permute.xlu0 %252  ;;  %v280_v34 = vsel %vm268_vm2, 0.0, %v255_v4  ;;  %v487_v51 = vmin.f32 %v479_v56, %v486_v3 }
  0xf1   :  { %v400_v6 = vsub.f32 %v231_v9, %v280_v34  ;;  %v279_v18 = vsel %vm268_vm2, 0.0, %v253_v12  ;;  %v518_v9 = vsel %vm473_vm4, %v469_v55, -inf }
  0xf2   :  { %v399_v40 = vsub.f32 %v230_v24, %v279_v18 }
  0xf3   :  { %v448_v20 = vand.u32 2147483647, %v400_v6 }
  0xf4   :  { %v447_v35 = vand.u32 2147483647, %v399_v40 }
  0xf5   :  { %v472_v30 = vadd.f32 %v460_v62, %v448_v20 }
  0xf7   :  { %v314_v48 = vpop.permute.xlu1 %313  ;;  %v492_v58 = vsel %vm473_vm4, %v472_v30, inf  ;;  %v524_v52 = vsel %vm473_vm4, %v472_v30, -inf }
  0xf8   :  { %v312_v53 = vpop.permute.xlu0 %311  ;;  %v339_v54 = vsel %vm219_vm3, %v314_v48, 0.0  ;;  %v525_v59 = vmax.f32 %v517_v44, %v524_v52  ;;  %v493_v6 = vmin.f32 %v485_v43, %v492_v58  ;;  %v519_v44 = vmax.f32 %v511_v0, %v518_v9 }
  0xf9   :  { %v338_v50 = vsel %vm219_vm3, %v312_v53, 0.0  ;;  %v435_v46 = vadd.f32 %v423_v36, %v339_v54 }
  0xfa   :  { %v434_v45 = vadd.f32 %v422_v23, %v338_v50 }
  0xfb   :  { %v459_v2 = vand.u32 2147483647, %v435_v46 }
  0xfc   :  { %v458_v63 = vand.u32 2147483647, %v434_v45 }
  0xfd   :  { %v471_v4 = vadd.f32 %v459_v2, %v447_v35 }
  0xfe   :  { %v470_v12 = vadd.f32 %v458_v63, %v446_v5 }
  0xff   :  { %v490_v34 = vsel %vm473_vm4, %v471_v4, inf  ;;  %v522_v13 = vsel %vm473_vm4, %v471_v4, -inf }
 0x100   :  { %v488_v15 = vsel %vm473_vm4, %v470_v12, inf  ;;  %v520_v8 = vsel %vm473_vm4, %v470_v12, -inf  ;;  %v523_v7 = vmax.f32 %v515_v42, %v522_v13  ;;  %v491_v57 = vmin.f32 %v483_v41, %v490_v34 }
 0x101   :  { %v521_v28 = vmax.f32 %v513_v39, %v520_v8  ;;  %v489_v27 = vmin.f32 %v481_v61, %v488_v15 }
 0x102   :  { %v527_v33 = vmax.f32 %v523_v7, %v525_v59  ;;  %v495_v42 = vmin.f32 %v491_v57, %v493_v6 }
 0x103   :  { %v526_v26 = vmax.f32 %v519_v44, %v521_v28  ;;  %v494_v31 = vmin.f32 %v487_v51, %v489_v27 }
 0x105   :  { %v528_v41 = vmax.f32 %v526_v26, %v527_v33  ;;  %v496_v43 = vmin.f32 %v494_v31, %v495_v42 }
 0x107   :  { %529 = vmax.xlane.f32.xlu1 %v528_v41  ;;  %497 = vmin.xlane.f32.xlu0 %v496_v43 }
 0x17a   :  { %v530_v19 = vpop.xlane.xlu1 %529  ;;  %v498_v60 = vpop.xlane.xlu0 %497 }
 0x17b   :  { %v531_v17 = vrot.slane %v530_v19, 4  ;;  %v499_v22 = vrot.slane %v498_v60, 4 }
 0x17d   :  { %v532_v39 = vmax.f32 %v530_v19, %v531_v17  ;;  %v500_v0 = vmin.f32 %v498_v60, %v499_v22 }
 0x17f   :  { %v533_v21 = vrot.slane %v532_v39, 2  ;;  %v501_v47 = vrot.slane %v500_v0, 2 }
 0x181   :  { %v534_v56 = vmax.f32 %v532_v39, %v533_v21  ;;  %v502_v11 = vmin.f32 %v500_v0, %v501_v47 }
 0x183   :  { %v503_v1 = vrot.slane %v502_v11, 1  ;;  %v535_v37 = vrot.slane %v534_v56, 1 }
 0x185   :  { %v504_v61 = vmin.f32 %v502_v11, %v503_v1  ;;  %v536_v10 = vmax.f32 %v534_v56, %v535_v37 }
 0x187   :  { %575 = vpush %v504_v61 }
 0x188   :  { %577 = vpush %v536_v10 }
 0x1b8   :  { %s576_s17 = spop %575 }
 0x1b9   :  { %543 = sst [smem:[#allocation5]] %s576_s17  ;;  %s578_s18 = spop %577 }
 0x1ba   :  { %545 = sst [smem:[#allocation5 + $0x1]] %s578_s18 }
 0x1bb   :  { %566 = dma.smem_to_hbm %s630_s19, 16, %s564_s16, [#allocation4]  }
 0x1bc   :  { %623 = dma.done.wait [#allocation4], 16  }
 0x1bd   :  { %624 = vsyncadd [#allocation4], 4294967280 }
 0x1be   :  { %571 = sfence }
 0x1bf   :  { %572 = vsyncpa [#allocation3], 1 }
 0x1c0   :  { %573 = vsyncpa [#allocation4], 1 }

</bundles_post_ra>
